<compile_context>
chip_gen: v5e
topology: v5e:2x2
jax: 0.10.0
libtpu: 0.0.40
codegen_flags: <defaults>
</compile_context>

<pallas_src>
import functools

import jax
import jax.numpy as jnp
from jax import lax
from jax.experimental import pallas as pl
from jax.experimental.pallas import tpu as pltpu


_LANES = 128
_MAX_BLOCK_ROWS = 2048   # (2048, 128) f32 = 1 MiB per input block


def _proj_loss_kernel(a_ref, b_ref, c_ref, o_ref, acc_xx, acc_xy, *,
                      total_rows, block_rows, need_mask):
    """Grid axis 0 walks row-blocks of the flattened tensors.

    acc_xx / acc_xy: VMEM (block_rows, 128) f32 elementwise accumulators for
    x*x and y*x.  The single cross-lane reduction happens at the last step.
    """
    i = pl.program_id(0)

    @pl.when(i == 0)
    def _():
        acc_xx[...] = jnp.zeros_like(acc_xx)
        acc_xy[...] = jnp.zeros_like(acc_xy)

    c = c_ref[...].astype(jnp.float32)
    x = a_ref[...].astype(jnp.float32) - c   # old_attack_mid - original_mid
    y = b_ref[...].astype(jnp.float32) - c   # new_mid        - original_mid

    if need_mask:
        # Ragged last block: zero out rows beyond the real extent so garbage
        # from the out-of-bounds DMA region contributes nothing.
        row = lax.broadcasted_iota(jnp.int32, (block_rows, _LANES), 0)
        valid = (i * block_rows + row) < total_rows
        x = jnp.where(valid, x, 0.0)
        y = jnp.where(valid, y, 0.0)

    acc_xx[...] += x * x
    acc_xy[...] += y * x

    @pl.when(i == pl.num_programs(0) - 1)
    def _():
        sxx = jnp.sum(acc_xx[...])
        sxy = jnp.sum(acc_xy[...])
        x_norm = jnp.sqrt(sxx)
        # Mirror torch: (y @ (x / ||x||)^T) / ||x||
        val = (sxy / x_norm) / x_norm
        o_ref[...] = jnp.reshape(val, (1, 1))


def proj_loss(old_attack_mid, new_mid, original_mid, coeff=None):
    """Pallas implementation of Proj_Loss.forward. Returns shape (1, 1) f32.

    `coeff` is unused in the reference forward pass; kept for signature parity.
    """
    del coeff

    flats = [jnp.ravel(t) for t in (old_attack_mid, new_mid, original_mid)]
    n = flats[0].shape[0]

    # Zero-padding is exact: both difference vectors are zero in the pad.
    pad = (-n) % _LANES
    if pad:
        flats = [jnp.pad(f, (0, pad)) for f in flats]
    slabs = [f.reshape(-1, _LANES) for f in flats]

    rows = slabs[0].shape[0]
    itemsize = jnp.dtype(slabs[0].dtype).itemsize
    # Sublane granularity: 8 for f32, 16 for bf16, 32 for int8.
    sub = max(8, 32 // itemsize)
    block_rows = min(_MAX_BLOCK_ROWS, ((rows + sub - 1) // sub) * sub)
    grid = (pl.cdiv(rows, block_rows),)
    need_mask = (rows % block_rows) != 0

    kernel = functools.partial(
        _proj_loss_kernel,
        total_rows=rows,
        block_rows=block_rows,
        need_mask=need_mask,
    )

    blk = pl.BlockSpec((block_rows, _LANES), lambda i: (i, 0))

    cost = pl.CostEstimate(
        flops=6 * n,
        transcendentals=1,
        bytes_accessed=3 * n * itemsize + 4,
    )

    out = pl.pallas_call(
        kernel,
        out_shape=jax.ShapeDtypeStruct((1, 1), jnp.float32),
        grid_spec=pltpu.PrefetchScalarGridSpec(
            num_scalar_prefetch=0,
            grid=grid,
            in_specs=[blk, blk, blk],
            out_specs=pl.BlockSpec((1, 1), lambda i: (0, 0)),
            scratch_shapes=[
                pltpu.VMEM((block_rows, _LANES), jnp.float32),
                pltpu.VMEM((block_rows, _LANES), jnp.float32),
            ],
        ),
        compiler_params=pltpu.CompilerParams(
            dimension_semantics=("arbitrary",),
            vmem_limit_bytes=32 * 1024 * 1024,
        ),
        cost_estimate=cost,
    )(*slabs)
    return out


def _reference(old_attack_mid, new_mid, original_mid):
    x = (old_attack_mid - original_mid).reshape(1, -1).astype(jnp.float32)
    y = (new_mid - original_mid).reshape(1, -1).astype(jnp.float32)
    xn = jnp.linalg.norm(x)
    return (y @ (x / xn).T) / xn


if __name__ == "__main__":
    key = jax.random.PRNGKey(0)
    k1, k2, k3 = jax.random.split(key, 3)

    # Small NCHW intermediate activations: batch=2, channels=4, spatial=16.
    shape = (2, 4, 16, 16)
    old_attack_mid = jax.random.normal(k1, shape, dtype=jnp.float32)
    new_mid = jax.random.normal(k2, shape, dtype=jnp.float32)
    original_mid = jax.random.normal(k3, shape, dtype=jnp.float32)
    coeff = 1.0  # unused by the forward pass

    out = proj_loss(old_attack_mid, new_mid, original_mid, coeff)
    jax.block_until_ready(out)

    ref = _reference(old_attack_mid, new_mid, original_mid)
    assert out.shape == (1, 1)
    assert jnp.allclose(out, ref, rtol=1e-5, atol=1e-5), (out, ref)

    print("KERNEL_OK")
</pallas_src>

<mosaic_0001>
module attributes {stable_mosaic.version = 11 : i64} {
  func.func @_proj_loss_kernel(%arg0: i32, %arg1: memref<16x128xf32, #tpu.memory_space<vmem>>, %arg2: memref<16x128xf32, #tpu.memory_space<vmem>>, %arg3: memref<16x128xf32, #tpu.memory_space<vmem>>, %arg4: memref<1x1xf32, #tpu.memory_space<vmem>>, %arg5: memref<16x128xf32, #tpu.memory_space<vmem>>, %arg6: memref<16x128xf32, #tpu.memory_space<vmem>>) attributes {dimension_semantics = [#tpu.dimension_semantics<arbitrary>], iteration_bounds = array<i64: 1>, scalar_prefetch = 0 : i64, scratch_operands = 2 : i64, tpu.core_type = #tpu.core_type<tc>, window_params = [{transform_indices = @transform_0, window_bounds = array<i64: 16, 128>}, {transform_indices = @transform_1, window_bounds = array<i64: 16, 128>}, {transform_indices = @transform_2, window_bounds = array<i64: 16, 128>}, {pipeline_mode = #tpu.pipeline_mode<synchronous>, transform_indices = @transform_3, window_bounds = array<i64: 1, 1>}]} {
    %c0_i32 = arith.constant 0 : i32
    %0 = arith.cmpi eq, %arg0, %c0_i32 : i32
    %1 = arith.extui %0 : i1 to i32
    %c0_i32_0 = arith.constant 0 : i32
    %2 = arith.cmpi ne, %1, %c0_i32_0 : i32
    scf.if %2 {
      %cst = arith.constant 0.000000e+00 : f32
      %19 = vector.broadcast %cst : f32 to vector<16x128xf32>
      %c0_16 = arith.constant 0 : index
      %c0_17 = arith.constant 0 : index
      %20 = vector.load %arg5[%c0_16, %c0_17] : memref<16x128xf32, #tpu.memory_space<vmem>>, vector<16x128xf32>
      tpu.vector_store %arg5[%c0_16, %c0_17], %19 {strides = array<i32>} : memref<16x128xf32, #tpu.memory_space<vmem>>, vector<16x128xf32>,
      %cst_18 = arith.constant 0.000000e+00 : f32
      %21 = vector.broadcast %cst_18 : f32 to vector<16x128xf32>
      %c0_19 = arith.constant 0 : index
      %c0_20 = arith.constant 0 : index
      %22 = vector.load %arg6[%c0_19, %c0_20] : memref<16x128xf32, #tpu.memory_space<vmem>>, vector<16x128xf32>
      tpu.vector_store %arg6[%c0_19, %c0_20], %21 {strides = array<i32>} : memref<16x128xf32, #tpu.memory_space<vmem>>, vector<16x128xf32>,
    } else {
    }
    %c0 = arith.constant 0 : index
    %c0_1 = arith.constant 0 : index
    %3 = vector.load %arg3[%c0, %c0_1] : memref<16x128xf32, #tpu.memory_space<vmem>>, vector<16x128xf32>
    %c0_2 = arith.constant 0 : index
    %c0_3 = arith.constant 0 : index
    %4 = vector.load %arg1[%c0_2, %c0_3] : memref<16x128xf32, #tpu.memory_space<vmem>>, vector<16x128xf32>
    %5 = arith.subf %4, %3 : vector<16x128xf32>
    %c0_4 = arith.constant 0 : index
    %c0_5 = arith.constant 0 : index
    %6 = vector.load %arg2[%c0_4, %c0_5] : memref<16x128xf32, #tpu.memory_space<vmem>>, vector<16x128xf32>
    %7 = arith.subf %6, %3 : vector<16x128xf32>
    %c0_6 = arith.constant 0 : index
    %c0_7 = arith.constant 0 : index
    %8 = vector.load %arg5[%c0_6, %c0_7] : memref<16x128xf32, #tpu.memory_space<vmem>>, vector<16x128xf32>
    %9 = arith.mulf %5, %5 : vector<16x128xf32>
    %10 = arith.addf %8, %9 : vector<16x128xf32>
    %c0_8 = arith.constant 0 : index
    %c0_9 = arith.constant 0 : index
    %11 = vector.load %arg5[%c0_8, %c0_9] : memref<16x128xf32, #tpu.memory_space<vmem>>, vector<16x128xf32>
    tpu.vector_store %arg5[%c0_8, %c0_9], %10 {strides = array<i32>} : memref<16x128xf32, #tpu.memory_space<vmem>>, vector<16x128xf32>,
    %c0_10 = arith.constant 0 : index
    %c0_11 = arith.constant 0 : index
    %12 = vector.load %arg6[%c0_10, %c0_11] : memref<16x128xf32, #tpu.memory_space<vmem>>, vector<16x128xf32>
    %13 = arith.mulf %7, %5 : vector<16x128xf32>
    %14 = arith.addf %12, %13 : vector<16x128xf32>
    %c0_12 = arith.constant 0 : index
    %c0_13 = arith.constant 0 : index
    %15 = vector.load %arg6[%c0_12, %c0_13] : memref<16x128xf32, #tpu.memory_space<vmem>>, vector<16x128xf32>
    tpu.vector_store %arg6[%c0_12, %c0_13], %14 {strides = array<i32>} : memref<16x128xf32, #tpu.memory_space<vmem>>, vector<16x128xf32>,
    %c0_i32_14 = arith.constant 0 : i32
    %16 = arith.cmpi eq, %arg0, %c0_i32_14 : i32
    %17 = arith.extui %16 : i1 to i32
    %c0_i32_15 = arith.constant 0 : i32
    %18 = arith.cmpi ne, %17, %c0_i32_15 : i32
    scf.if %18 {
      %c0_16 = arith.constant 0 : index
      %c0_17 = arith.constant 0 : index
      %19 = vector.load %arg5[%c0_16, %c0_17] : memref<16x128xf32, #tpu.memory_space<vmem>>, vector<16x128xf32>
      %20 = vector.shape_cast %19 : vector<16x128xf32> to vector<1x16x128xf32>
      %cst = arith.constant dense<0.000000e+00> : vector<1xf32>
      %21 = vector.multi_reduction <add>, %20, %cst [1, 2] : vector<1x16x128xf32> to vector<1xf32>
      %22 = vector.shape_cast %21 : vector<1xf32> to vector<1x1x1xf32>
      %23 = vector.extract %22[0, 0, 0] : f32 from vector<1x1x1xf32>
      %c0_18 = arith.constant 0 : index
      %c0_19 = arith.constant 0 : index
      %24 = vector.load %arg6[%c0_18, %c0_19] : memref<16x128xf32, #tpu.memory_space<vmem>>, vector<16x128xf32>
      %25 = vector.shape_cast %24 : vector<16x128xf32> to vector<1x16x128xf32>
      %cst_20 = arith.constant dense<0.000000e+00> : vector<1xf32>
      %26 = vector.multi_reduction <add>, %25, %cst_20 [1, 2] : vector<1x16x128xf32> to vector<1xf32>
      %27 = vector.shape_cast %26 : vector<1xf32> to vector<1x1x1xf32>
      %28 = vector.extract %27[0, 0, 0] : f32 from vector<1x1x1xf32>
      %29 = math.sqrt %23 : f32
      %30 = arith.divf %28, %29 : f32
      %31 = arith.divf %30, %29 : f32
      %32 = vector.broadcast %31 : f32 to vector<1x1xf32>
      %c0_21 = arith.constant 0 : index
      %c0_22 = arith.constant 0 : index
      %33 = vector.load %arg4[%c0_21, %c0_22] : memref<1x1xf32, #tpu.memory_space<vmem>>, vector<1x1xf32>
      tpu.vector_store %arg4[%c0_21, %c0_22], %32 {strides = array<i32>} : memref<1x1xf32, #tpu.memory_space<vmem>>, vector<1x1xf32>,
    } else {
    }
    return
  }
  func.func @transform_0(%arg0: i32) -> (i32, i32) {
    %c0_i32 = arith.constant 0 : i32
    %c0_i32_0 = arith.constant 0 : i32
    return %arg0, %c0_i32 : i32, i32
  }
  func.func @transform_1(%arg0: i32) -> (i32, i32) {
    %c0_i32 = arith.constant 0 : i32
    %c0_i32_0 = arith.constant 0 : i32
    return %arg0, %c0_i32 : i32, i32
  }
  func.func @transform_2(%arg0: i32) -> (i32, i32) {
    %c0_i32 = arith.constant 0 : i32
    %c0_i32_0 = arith.constant 0 : i32
    return %arg0, %c0_i32 : i32, i32
  }
  func.func @transform_3(%arg0: i32) -> (i32, i32) {
    %c0_i32 = arith.constant 0 : i32
    %c0_i32_0 = arith.constant 0 : i32
    %c0_i32_1 = arith.constant 0 : i32
    return %c0_i32, %c0_i32_0 : i32, i32
  }
}

</mosaic_0001>

<bundles_post_ra>
// kernel: tpu_custom_call.1
= control target key start
LH: loop header
LB: loop body
LE: loop exit
PB: predicated region body
PF: predicated region fallthrough
CT: control target
= control target key end

     0   :  { %8 = vsyncpa [#allocation5], 0  ;;  %s350_s0 = inlined_call_operand.hbm [shape: f32[16,128], index: 0, kind: input, shape index: {}]   ;;  %s351_s1 = inlined_call_operand.hbm [shape: f32[16,128], index: 1, kind: input, shape index: {}]   ;;  %s352_s2 = inlined_call_operand.hbm [shape: f32[16,128], index: 2, kind: input, shape index: {}]   ;;  %s353_s3 = inlined_call_operand.hbm [shape: f32[1,1], index: 3, kind: output, shape index: {}]  }
   0x1   :  { %9 = vsyncpa [#allocation8], 0 }
   0x2   :  { %10 = vsyncpa [#allocation6], 0  ;;  %s28_s14 = sshll.u32 %s351_s1, 4  ;;  %s312_s15 = smov [#allocation7]   ;;  %s29_s14 = int_to_ptr.hbm [resolvable:$true] %s28_s14 }
   0x3   :  { %s30_s16 = sshll.u32 %s312_s15, 4  ;;  %s15_s19 = sshll.u32 %s350_s0, 4  ;;  %s31_s16 = int_to_ptr.vmem [resolvable:$true] %s30_s16  ;;  %s16_s19 = int_to_ptr.hbm [resolvable:$true] %s15_s19 }
   0x4   :  { %s313_s20 = smov 128   ;;  %s314_s21 = smov 8  }
   0x5   :  { %36 = dma.hbm_to_vmem [thread:$0]  %s29_s14, 256, %s31_s16, [#allocation8], %s313_s20, %s313_s20, %s314_s21  }
   0x6   :  { %s315_s22 = smov [#allocation4]   ;;  %s41_s26 = sshll.u32 %s352_s2, 4  ;;  %s42_s26 = int_to_ptr.hbm [resolvable:$true] %s41_s26 }
   0x7   :  { %s17_s23 = sshll.u32 %s315_s22, 4  ;;  %s316_s1 = smov [#allocation9]   ;;  %s18_s23 = int_to_ptr.vmem [resolvable:$true] %s17_s23 }
   0x8   :  { %23 = dma.hbm_to_vmem [thread:$0]  %s16_s19, 256, %s18_s23, [#allocation5], %s313_s20, %s313_s20, %s314_s21  }
   0x9   :  { %s43_s27 = sshll.u32 %s316_s1, 4  ;;  %s44_s27 = int_to_ptr.vmem [resolvable:$true] %s43_s27 }
   0xa   :  { %49 = dma.hbm_to_vmem [thread:$0]  %s42_s26, 256, %s44_s27, [#allocation8], %s313_s20, %s313_s20, %s314_s21  }
   0xb   :  { %306 = dma.done.wait [#allocation5], 256  }
   0xc   :  { %307 = vsyncadd [#allocation5], 4294967040 }
   0xd   :  { %308 = dma.done.wait [#allocation8], 512  }
   0xe   :  { %309 = vsyncadd [#allocation8], 4294966784  ;;  %v70_v0 = vld [vmem:[#allocation9] sm:$0xff]  ;;  %v71_v1 = vld [vmem:[#allocation9 + $0x8] sm:$0xff]  ;;  %s317_s30 = smov [#allocation10]   ;;  %s181_s8 = sshll.u32 %s353_s3, 4  ;;  %s182_s8 = int_to_ptr.hbm [resolvable:$true] %s181_s8 }
   0xf   :  { %v72_v2 = vld [vmem:[#allocation4] sm:$0xff]  ;;  %v73_v3 = vld [vmem:[#allocation4 + $0x8] sm:$0xff]  ;;  %v76_v5 = vld [vmem:[#allocation7] sm:$0xff]  ;;  %s179_s4 = sshll.u32 %s317_s30, 4  ;;  %vm172_vm6 = vcmask 0   ;;  %s180_s4 = int_to_ptr.vmem [resolvable:$true] %s179_s4 }
  0x10   :  { %v74_v4 = vsub.f32 %v72_v2, %v70_v0  ;;  %v77_v6 = vld [vmem:[#allocation7 + $0x8] sm:$0xff]  ;;  %v75_v7 = vsub.f32 %v73_v3, %v71_v1  ;;  %v78_v10 = vsub.f32 %v76_v5, %v70_v0 }
  0x11   :  { %v79_v11 = vsub.f32 %v77_v6, %v71_v1 }
  0x12   :  { %v82_v8 = vmul.f32 %v74_v4, %v74_v4  ;;  %v83_v9 = vmul.f32 %v75_v7, %v75_v7  ;;  %v90_v13 = vmul.f32 %v78_v10, %v74_v4 }
  0x13   :  { %v91_v14 = vmul.f32 %v79_v11, %v75_v7 }
  0x14   :  { %v101_v12 = vadd.f32 %v83_v9, %v82_v8 }
  0x15   :  { %v113_v15 = vadd.f32 %v91_v14, %v90_v13 }
  0x16   :  { %102 = vadd.xlane.f32.xlu0 %v101_v12 }
  0x1e   :  { %114 = vadd.xlane.f32.xlu0 %v113_v15 }
  0x89   :  { %v103_v16 = vpop.xlane.xlu0 %102 }
  0x8a   :  { %v104_v17 = vrot.slane %v103_v16, 4 }
  0x8c   :  { %v105_v18 = vadd.f32 %v104_v17, %v103_v16 }
  0x8e   :  { %v106_v19 = vrot.slane %v105_v18, 2 }
  0x90   :  { %v107_v20 = vadd.f32 %v106_v19, %v105_v18 }
  0x91   :  { %v115_v23 = vpop.xlane.xlu0 %114 }
  0x92   :  { %v108_v21 = vrot.slane %v107_v20, 1  ;;  %v116_v24 = vrot.slane %v115_v23, 4 }
  0x94   :  { %v109_v22 = vadd.f32 %v108_v21, %v107_v20  ;;  %v117_v25 = vadd.f32 %v116_v24, %v115_v23 }
  0x96   :  { %192 = vpush %v109_v22  ;;  %v118_v26 = vrot.slane %v117_v25, 2 }
  0x98   :  { %v119_v27 = vadd.f32 %v118_v26, %v117_v25 }
  0x9a   :  { %v120_v28 = vrot.slane %v119_v27, 1 }
  0x9c   :  { %v121_v29 = vadd.f32 %v120_v28, %v119_v27 }
  0x9e   :  { %194 = vpush %v121_v29 }
  0xc7   :  { %s193_s0 = spop %192 }
  0xc8   :  { %v123_v30 = vstv %s193_s0 }
  0xc9   :  { %206 = vrsqrt.f32 %v123_v30  ;;  %vm131_vm0 = vcmp.eq.f32.partialorder %v123_v30, inf  ;;  %v134_v38 = vand.u32 2147483648, %v123_v30  ;;  %vm133_vm1 = vcmp.eq.f32.partialorder %v123_v30, 0.0 }
  0xcf   :  { %v207_v31 = vpop.eup %206  ;;  %s195_s2 = spop %194 }
  0xd0   :  { %v125_v32 = vmul.f32 %v207_v31, %v123_v30 }
  0xd2   :  { %v126_v33 = vmul.f32 %v207_v31, %v125_v32 }
  0xd4   :  { %v127_v34 = vmul.f32 0.5, %v126_v33 }
  0xd6   :  { %v128_v35 = vsub.f32 1.5, %v127_v34 }
  0xd8   :  { %v129_v36 = vmul.f32 %v207_v31, %v128_v35 }
  0xda   :  { %v130_v37 = vmul.f32 %v129_v36, %v123_v30 }
  0xdc   :  { %v132_v39 = vsel %vm131_vm0, %v123_v30, %v130_v37 }
  0xdd   :  { %v135_v40 = vsel %vm133_vm1, %v134_v38, %v132_v39 }
  0xde   :  { %196 = vpush %v135_v40 }
 0x10f   :  { %s197_s28 = spop %196 }
 0x110   :  { %v137_v41 = vstv %s197_s28 }
 0x111   :  { %208 = vrcp.f32 %v137_v41  ;;  %v149_v45 = vand.u32 2147483648, %v137_v41  ;;  %v147_v47 = vand.u32 2147483647, %v137_v41  ;;  %vm143_vm3 = vweird.f32 %v137_v41 }
 0x113   :  { %v150_v49 = vor.u32 1.1754944e-38, %v149_v45  ;;  %vm148_vm5 = vcmp.eq.f32.partialorder %v147_v47, 8.507059e+37 }
 0x117   :  { %v209_v42 = vpop.eup %208 }
 0x118   :  { %v139_v43 = vmul.f32 %v209_v42, %v137_v41  ;;  %vm144_vm2 = vweird.f32 %v209_v42 }
 0x119   :  { %vm145_vm4 = vmor %vm143_vm3, %vm144_vm2 }
 0x11a   :  { %v140_v44 = vsub.f32 1.0, %v139_v43 }
 0x11c   :  { %v141_v46 = vmul.f32 %v209_v42, %v140_v44 }
 0x11e   :  { %v142_v48 = vadd.f32 %v209_v42, %v141_v46 }
 0x120   :  { %v146_v50 = vsel %vm145_vm4, %v209_v42, %v142_v48 }
 0x121   :  { %v151_v51 = vsel %vm148_vm5, %v150_v49, %v146_v50 }
 0x122   :  { %198 = vpush %v151_v51 }
 0x153   :  { %s199_s29 = spop %198 }
 0x154   :  { %s153_s5 = smul.f32 %s199_s29, %s195_s2 }
 0x156   :  { %s170_s9 = smul.f32 %s199_s29, %s153_s5 }
 0x158   :  { %v171_v52 = vstv %s170_s9 }
 0x159   :  { %173 = vst.msk [vmem:[#allocation10] sm:$0x1] %vm172_vm6, %v171_v52 }
 0x15a   :  { %184 = dma.vmem_to_hbm [thread:$0]  %s180_s4, 16, %s182_s8, [#allocation6]  }
 0x15b   :  { %310 = dma.done.wait [#allocation6], 16  }
 0x15c   :  { %311 = vsyncadd [#allocation6], 4294967280 }
 0x15d   :  { %189 = vsyncpa [#allocation5], 1 }
 0x15e   :  { %190 = vsyncpa [#allocation8], 1 }
 0x15f   :  { %191 = vsyncpa [#allocation6], 1 }

</bundles_post_ra>
